<compile_context>
chip_gen: v5e
topology: v5e:2x2
jax: 0.10.0
libtpu: 0.0.40
codegen_flags: <defaults>
</compile_context>

<pallas_src>
import functools

import numpy as np
import jax
import jax.numpy as jnp
from jax.experimental import pallas as pl
from jax.experimental.pallas import tpu as pltpu


_VMEM_TILE_BUDGET = 20 * 1024 * 1024   # target working-set (pre double-buffer margin)


def _round_up(x, m):
    return (x + m - 1) // m * m


def _pick_col_tile(N, block_n):
    """Lane-dense output-column tile. Returns (tn, padded_N)."""
    if N < 128:
        return 128, 128                       # pad tiny heads to one full tile
    Np = _round_up(N, 128)
    # Prefer 256-granular tiles (v6e/v7x MXU is 256 wide), fall back to 128.
    for gran in (256, 128):
        t = (min(block_n, Np) // gran) * gran
        while t >= gran:
            if Np % t == 0:
                return t, Np
            t -= gran
    return 128, Np                            # unreachable (128 always divides Np)


def _pick_row_tile(M, block_m):
    """Row tile (multiple of 8) minimizing tail padding. Returns (tm, padded_M)."""
    M8 = _round_up(max(M, 1), 8)
    bm = max(8, (block_m // 8) * 8)
    if M8 <= bm:
        return M8, M8
    best_t = bm
    best_pad = _round_up(M8, bm) - M8
    t = bm - 8
    while t >= max(8, bm // 2) and best_pad > 0:
        pad = _round_up(M8, t) - M8
        if pad < best_pad:
            best_t, best_pad = t, pad
        t -= 8
    return best_t, _round_up(M8, best_t)


def _vmem_estimate(tm, tn, tk, k_tiled, x_is, w_is, out_is):
    est = 2 * (tm * tk * x_is + tn * tk * w_is + tn * 4)   # double-buffered inputs
    est += 2 * tm * tn * out_is                            # double-buffered output
    if k_tiled:
        est += tm * tn * 4                                 # f32 accumulator scratch
    return est


def _linear_kernel(x_ref, w_ref, b_ref, o_ref, *, std_init, mm_dtype):
    """Single-shot (no K tiling): o = std_init * (x @ w.T) + b_fused."""
    x = x_ref[...]
    w = w_ref[...]
    if mm_dtype is not None:
        x = x.astype(mm_dtype)
        w = w.astype(mm_dtype)
    acc = jax.lax.dot_general(x, w, (((1,), (1,)), ((), ())),
                              preferred_element_type=jnp.float32)
    if std_init != 1.0:
        acc = acc * std_init
    o_ref[...] = (acc + b_ref[...]).astype(o_ref.dtype)


def _linear_kernel_kacc(x_ref, w_ref, b_ref, o_ref, acc_ref, *, std_init, mm_dtype):
    """K-tiled variant with an f32 VMEM accumulator (K is grid axis 2)."""
    k = pl.program_id(2)

    @pl.when(k == 0)
    def _():
        acc_ref[...] = jnp.zeros_like(acc_ref)

    x = x_ref[...]
    w = w_ref[...]
    if mm_dtype is not None:
        x = x.astype(mm_dtype)
        w = w.astype(mm_dtype)
    acc_ref[...] += jax.lax.dot_general(x, w, (((1,), (1,)), ((), ())),
                                        preferred_element_type=jnp.float32)

    @pl.when(k == pl.num_programs(2) - 1)
    def _():
        acc = acc_ref[...]
        if std_init != 1.0:
            acc = acc * std_init
        o_ref[...] = (acc + b_ref[...]).astype(o_ref.dtype)


def linear_layer_forward(x, weight, bias, std_init=1.0, bias_init=0.0, *,
                         block_m=512, block_n=512, block_k=2048,
                         matmul_dtype=None, out_dtype=jnp.float32):
    """Pallas TPU forward: std_init * (x @ weight.T + bias) + bias_init.

    x: (..., in_dim); weight: (out_dim, in_dim) (passed as-is, NOT transposed);
    bias: (out_dim,).
    matmul_dtype: opt-in approximation -- cast matmul operands (inside the
        kernel) e.g. to bf16; accumulation and epilogue stay f32.
    out_dtype: output dtype; bf16 halves output HBM write traffic (opt-in).
    block_m/block_n: row / output-column tile targets (auto-shrunk to a VMEM
        budget). block_k: in_dim beyond this gets a K grid axis + accumulator.
    """
    *lead, K = x.shape
    N, K2 = weight.shape
    assert K == K2, "weight in_dim must match input last dim"
    M = int(np.prod(lead)) if lead else 1

    x2 = jnp.asarray(x).reshape(M, K)
    w = jnp.asarray(weight)                                   # (N, K), no transpose copy
    # Fold the affine epilogue into the bias: out = std_init*acc + b_fused.
    b_fused = (float(std_init) * jnp.asarray(bias, jnp.float32)
               + float(bias_init)).reshape(1, N)

    # ---- output-column tile (always lane-dense; tiny/odd heads padded) ----
    tn, Np = _pick_col_tile(N, block_n)
    if Np != N:
        w = jnp.pad(w, ((0, Np - N), (0, 0)))
        b_fused = jnp.pad(b_fused, ((0, 0), (0, Np - N)))

    # ---- K tiling for large in_dim (bounds per-step VMEM) ----
    if K > block_k:
        tk = max(128, (min(block_k, K) // 128) * 128)
        Kp = _round_up(K, tk)
        if Kp != K:
            x2 = jnp.pad(x2, ((0, 0), (0, Kp - K)))
            w = jnp.pad(w, ((0, 0), (0, Kp - K)))
        k_tiled = True
    else:
        tk, Kp, k_tiled = K, K, False

    # ---- row tile, shrunk against the VMEM working-set budget ----
    x_is = x2.dtype.itemsize
    w_is = w.dtype.itemsize
    out_is = jnp.dtype(out_dtype).itemsize
    bm = max(8, (block_m // 8) * 8)
    while bm > 64 and _vmem_estimate(bm, tn, tk, k_tiled, x_is, w_is, out_is) \
            > _VMEM_TILE_BUDGET:
        bm = max(64, ((bm // 2) // 8) * 8)
    tm, Mp = _pick_row_tile(M, bm)

    # Keep >= 2 parallel tiles when there is meaningful work (v7x has 2 TCs).
    if (Mp // tm) * (Np // tn) < 2 and Mp >= 64:
        tm = _round_up(pl.cdiv(Mp, 2), 8)
        Mp = 2 * tm

    if Mp != M:
        x2 = jnp.pad(x2, ((0, Mp - M), (0, 0)))

    gM, gN, gK = Mp // tm, Np // tn, Kp // tk

    # Shape-dependent grid order: the bigger of {x, weight} gets the constant
    # block index along the inner axis -> it is read from HBM only once
    # (only matters when there is no K axis; harmless otherwise).
    n_outer = (Np * Kp) > (Mp * Kp)

    if k_tiled:
        if n_outer:
            grid = (gN, gM, gK)
            x_map = lambda j, i, k: (i, k)
            w_map = lambda j, i, k: (j, k)
            b_map = lambda j, i, k: (0, j)
            o_map = lambda j, i, k: (i, j)
        else:
            grid = (gM, gN, gK)
            x_map = lambda i, j, k: (i, k)
            w_map = lambda i, j, k: (j, k)
            b_map = lambda i, j, k: (0, j)
            o_map = lambda i, j, k: (i, j)
        kernel = functools.partial(_linear_kernel_kacc,
                                   std_init=float(std_init), mm_dtype=matmul_dtype)
        scratch = [pltpu.VMEM((tm, tn), jnp.float32)]
        semantics = ("parallel", "parallel", "arbitrary")
        x_block, w_block = (tm, tk), (tn, tk)
    else:
        if n_outer:
            grid = (gN, gM)
            x_map = lambda j, i: (i, 0)
            w_map = lambda j, i: (j, 0)
            b_map = lambda j, i: (0, j)
            o_map = lambda j, i: (i, j)
        else:
            grid = (gM, gN)
            x_map = lambda i, j: (i, 0)
            w_map = lambda i, j: (j, 0)
            b_map = lambda i, j: (0, j)
            o_map = lambda i, j: (i, j)
        kernel = functools.partial(_linear_kernel,
                                   std_init=float(std_init), mm_dtype=matmul_dtype)
        scratch = []
        semantics = ("parallel", "parallel")
        x_block, w_block = (tm, Kp), (tn, Kp)

    est = _vmem_estimate(tm, tn, tk, k_tiled, x_is, w_is, out_is)
    vmem_limit = int(min(max(2 * est + (4 << 20), 32 << 20), 48 << 20))

    out = pl.pallas_call(
        kernel,
        out_shape=jax.ShapeDtypeStruct((Mp, Np), out_dtype),
        grid_spec=pltpu.PrefetchScalarGridSpec(
            num_scalar_prefetch=0,
            grid=grid,
            in_specs=[
                pl.BlockSpec(x_block, x_map),   # activation rows
                pl.BlockSpec(w_block, w_map),   # weight as (out, in) -- no transpose
                pl.BlockSpec((1, tn), b_map),   # fused bias slice
            ],
            out_specs=pl.BlockSpec((tm, tn), o_map),
            scratch_shapes=scratch),
        compiler_params=pltpu.CompilerParams(
            dimension_semantics=semantics,
            vmem_limit_bytes=vmem_limit),
    )(x2, w, b_fused)

    out = out[:M, :N]
    return out.reshape(*lead, N)


def init_linear_params(key, in_dim, out_dim, *, is_first=False, freq_init=False):
    """Deterministic init matching LinearLayer.__init__ distributions."""
    kw, kb = jax.random.split(key)
    if is_first:
        w = jax.random.uniform(kw, (out_dim, in_dim),
                               minval=-1.0 / in_dim, maxval=1.0 / in_dim,
                               dtype=jnp.float32)
    elif freq_init:
        bound = np.sqrt(6.0 / in_dim) / 25.0
        w = jax.random.uniform(kw, (out_dim, in_dim),
                               minval=-bound, maxval=bound, dtype=jnp.float32)
    else:
        gain = np.sqrt(2.0 / (1.0 + 0.2 ** 2))       # kaiming_normal(a=0.2), scaled 0.25
        std = 0.25 * gain / np.sqrt(in_dim)
        w = std * jax.random.normal(kw, (out_dim, in_dim), dtype=jnp.float32)
    b_bound = np.sqrt(1.0 / in_dim)
    b = jax.random.uniform(kb, (out_dim,),
                           minval=-b_bound, maxval=b_bound, dtype=jnp.float32)
    return w, b


def linear_layer_ref(x, weight, bias, std_init=1.0, bias_init=0.0):
    """Pure-JAX reference mirroring the PyTorch forward."""
    y = jnp.einsum("...k,nk->...n", x, weight,
                   precision=jax.lax.Precision.HIGHEST)
    return std_init * (y + bias) + bias_init


if __name__ == "__main__":
    key = jax.random.PRNGKey(0)
    kx1, kx2, kx3 = jax.random.split(jax.random.fold_in(key, 0), 3)

    # 1) Feature-MLP shape: leading dims flatten to M=512; K=32, N=128 (f32 path,
    #    2-D grid, weight VMEM-resident, exact vs reference).
    x1 = jax.random.normal(kx1, (2, 8, 32, 32), dtype=jnp.float32)
    w1, b1 = init_linear_params(jax.random.fold_in(key, 1), 32, 128)
    ref1 = linear_layer_ref(x1, w1, b1)
    out1 = jax.block_until_ready(linear_layer_forward(x1, w1, b1))
    np.testing.assert_allclose(np.asarray(out1), np.asarray(ref1),
                               rtol=1e-5, atol=1e-5)

    # 2) K-tiled accumulator path (forced with block_k=128) + non-default affine.
    x2 = jax.random.normal(kx2, (2, 4, 16, 256), dtype=jnp.float32)
    w2, b2 = init_linear_params(jax.random.fold_in(key, 2), 256, 256)
    ref2 = linear_layer_ref(x2, w2, b2, std_init=2.0, bias_init=0.5)
    out2 = jax.block_until_ready(
        linear_layer_forward(x2, w2, b2, std_init=2.0, bias_init=0.5, block_k=128))
    np.testing.assert_allclose(np.asarray(out2), np.asarray(ref2),
                               rtol=1e-4, atol=1e-4)

    # 3) Tiny head (out_dim=3 < 128 lanes) -> padded lane-dense tile, sliced back.
    x3 = jax.random.normal(kx3, (2, 4, 16, 48), dtype=jnp.float32)
    w3, b3 = init_linear_params(jax.random.fold_in(key, 3), 48, 3)
    ref3 = linear_layer_ref(x3, w3, b3)
    out3 = jax.block_until_ready(linear_layer_forward(x3, w3, b3))
    np.testing.assert_allclose(np.asarray(out3), np.asarray(ref3),
                               rtol=1e-5, atol=1e-5)

    # 4) Opt-in approximation: bf16 matmul operands (cast inside the kernel,
    #    f32 accumulation) + bf16 output. Documented as NOT bit-faithful.
    out4 = jax.block_until_ready(
        linear_layer_forward(x1, w1, b1, matmul_dtype=jnp.bfloat16,
                             out_dtype=jnp.bfloat16))
    np.testing.assert_allclose(np.asarray(out4, dtype=np.float32),
                               np.asarray(ref1), rtol=5e-2, atol=5e-2)

    print("KERNEL_OK")
</pallas_src>

<mosaic_0001>
module attributes {stable_mosaic.version = 11 : i64} {
  func.func @_linear_kernel(%arg0: i32, %arg1: i32, %arg2: memref<256x32xf32, #tpu.memory_space<vmem>>, %arg3: memref<128x32xf32, #tpu.memory_space<vmem>>, %arg4: memref<1x128xf32, #tpu.memory_space<vmem>>, %arg5: memref<256x128xf32, #tpu.memory_space<vmem>>) attributes {dimension_semantics = [#tpu.dimension_semantics<parallel>, #tpu.dimension_semantics<parallel>], iteration_bounds = array<i64: 2, 1>, scalar_prefetch = 0 : i64, scratch_operands = 0 : i64, tpu.core_type = #tpu.core_type<tc>, window_params = [{transform_indices = @transform_0, window_bounds = array<i64: 256, 32>}, {transform_indices = @transform_1, window_bounds = array<i64: 128, 32>}, {transform_indices = @transform_2, window_bounds = array<i64: 1, 128>}, {transform_indices = @transform_3, window_bounds = array<i64: 256, 128>}]} {
    %c0 = arith.constant 0 : index
    %c0_0 = arith.constant 0 : index
    %0 = vector.load %arg2[%c0, %c0_0] : memref<256x32xf32, #tpu.memory_space<vmem>>, vector<256x32xf32>
    %c0_1 = arith.constant 0 : index
    %c0_2 = arith.constant 0 : index
    %1 = vector.load %arg3[%c0_1, %c0_2] : memref<128x32xf32, #tpu.memory_space<vmem>>, vector<128x32xf32>
    %cst = arith.constant dense<0.000000e+00> : vector<256x128xf32>
    %2 = tpu.matmul %0, %1, %cst {dimension_numbers = #tpu.dot_dimension_numbers<[1], [1], [0], [0], [0, 0, 1, 0], [], []>} : vector<256x32xf32>, vector<128x32xf32>, vector<256x128xf32> -> vector<256x128xf32>
    %c0_3 = arith.constant 0 : index
    %c0_4 = arith.constant 0 : index
    %3 = vector.load %arg4[%c0_3, %c0_4] : memref<1x128xf32, #tpu.memory_space<vmem>>, vector<1x128xf32>
    %4 = vector.broadcast %3 : vector<1x128xf32> to vector<256x128xf32>
    %5 = arith.addf %2, %4 : vector<256x128xf32>
    %c0_5 = arith.constant 0 : index
    %c0_6 = arith.constant 0 : index
    %6 = vector.load %arg5[%c0_5, %c0_6] : memref<256x128xf32, #tpu.memory_space<vmem>>, vector<256x128xf32>
    tpu.vector_store %arg5[%c0_5, %c0_6], %5 {strides = array<i32>} : memref<256x128xf32, #tpu.memory_space<vmem>>, vector<256x128xf32>,
    return
  }
  func.func @transform_0(%arg0: i32, %arg1: i32) -> (i32, i32) {
    %c0_i32 = arith.constant 0 : i32
    %c0_i32_0 = arith.constant 0 : i32
    return %arg0, %c0_i32 : i32, i32
  }
  func.func @transform_1(%arg0: i32, %arg1: i32) -> (i32, i32) {
    %c0_i32 = arith.constant 0 : i32
    %c0_i32_0 = arith.constant 0 : i32
    return %arg1, %c0_i32 : i32, i32
  }
  func.func @transform_2(%arg0: i32, %arg1: i32) -> (i32, i32) {
    %c0_i32 = arith.constant 0 : i32
    %c0_i32_0 = arith.constant 0 : i32
    return %c0_i32, %arg1 : i32, i32
  }
  func.func @transform_3(%arg0: i32, %arg1: i32) -> (i32, i32) {
    %c0_i32 = arith.constant 0 : i32
    return %arg0, %arg1 : i32, i32
  }
}

</mosaic_0001>

<bundles_post_ra>
// kernel: tpu_custom_call.1
= control target key start
LH: loop header
LB: loop body
LE: loop exit
PB: predicated region body
PF: predicated region fallthrough
CT: control target
= control target key end

     0   :  { %8 = vsyncpa [#allocation3], 0  ;;  %s1302_s0 = inlined_call_operand.vmem [shape: f32[512,32], index: 0, kind: input, shape index: {}]   ;;  %s1303_s1 = inlined_call_operand.vmem [shape: f32[128,32], index: 1, kind: input, shape index: {}]   ;;  %s1304_s2 = inlined_call_operand.vmem [shape: f32[1,128], index: 2, kind: input, shape index: {}]   ;;  %s1305_s3 = inlined_call_operand.hbm [shape: f32[512,128], index: 3, kind: output, shape index: {}]  }
   0x1   :  { %10 = vsyncpa [#allocation3 + $0x1], 0  ;;  %s952_s12 = smov 0   ;;  %s954_s13 = smov 0  }
   0x2   :  { %s956_s14 = smov 0   ;;  %s958_s15 = smov 0  }
   0x3   :  { %s960_s16 = smov 0   ;;  %s962_s17 = smov 0  }
   0x4 LB: > { %s680_s18 = sadd.s32 4294967295, %s928_s17   ;;  %s681_s19 = sadd.s32 4294967294, %s928_s17   ;;  %s928_s17 = sphi %s962_s17, %s16_s17   ;;  %s924_s16 = sphi %s960_s16, %s1312_s16   ;;  %s920_s15 = sphi %s958_s15, %s1311_s15   ;;  %s916_s14 = sphi %s956_s14, %s1310_s14   ;;  %s912_s13 = sphi %s954_s13, %s1309_s13   ;;  %s908_s12 = sphi %s952_s12, %s1308_s12  }
   0x5   : > { %s28_s20 = sadd.s32 1, %s924_s16  ;;  %s115_s21 = sadd.s32 1, %s916_s14 }
   0x6   : > { %p30_p0 = scmp.ge.s32.totalorder %s28_s20, 2  ;;  %p125_p1 = scmp.ne.s32.totalorder %s916_s14, %s912_s13 }
   0x7   : > { %p126_p2 = scmp.eq.s32.totalorder %s680_s18, 1  ;;  %p131_p3 = scmp.ne.s32.totalorder %s912_s13, %s908_s12 }
   0x8   : > { %s1314_s20 = smov (%p30_p0, %s28_s20), 0  ;;  %p132_p5 = scmp.eq.s32.totalorder %s681_s19, 1 }
   0x9   : > { %p992_p4 = por %p126_p2, %p125_p1  ;;  %s110_s23 = ssub.s32 %s924_s16, %s1314_s20 }
   0xa   : > { %p686_p6 = scmp.ge.s32.totalorder %s928_s17, 1  ;;  %p113_p7 = scmp.eq.s32.totalorder %s110_s23, 0 }
   0xb   : > { %p999_p8 = por %p132_p5, %p131_p3  ;;  %p174_p9 = scmp.lt.s32.totalorder %s928_s17, 3 }
   0xc   : > { %s1005_s25 = scalar_select %p113_p7, %s916_s14, %s115_s21  }
   0xd   : > { %p175_p10 = pnand %p686_p6, %p174_p9 }
   0xe   : > { %s688_s6 = sshll.u32 (!%p175_p10), %s920_s15, 5  ;;  %s203_s29 = sand.u32 (!%p175_p10), 1, %s912_s13  }
   0xf   : > { %178 = sbr.rel (%p175_p10) target bundleno = 279 (0x117), region = 32  ;;  %p207_p11 = scmp.lt.s32.totalorder (!%p175_p10), %s688_s6, 63 }
  0x10   : > { %s687_s30 = sshll.u32 (!%p175_p10), %s203_s29, 8  ;;  %s743_s7 = sshll.u32 (!%p175_p10), %s920_s15, 8 }
  0x11   : > { %s577_s10 = scalar_lea.hbm (!%p175_p10), %s1305_s3, %s743_s7  ;;  %s565_s18 = scalar_lea.sflag (!%p175_p10), [#allocation3], %s203_s29 }
  0x12   : > { %s580_s11 = sshll.u32 (!%p175_p10), %s577_s10, 4  ;;  %s870_s27 = scalar_lea.hbm (!%p175_p10), %s1305_s3, 512  ;;  %s581_s11 = int_to_ptr.hbm [resolvable:$true] %s580_s11 }
  0x14   : > { %v269_v0 = vld [vmem:[%s1303_s1 + $0x78] sm:$0xff]  ;;  %vm274_vm0 = vcmask 261120   ;;  %v268_v1 = vld [vmem:[%s1303_s1 + $0x70] sm:$0xff]  ;;  %v267_v2 = vld [vmem:[%s1303_s1 + $0x68] sm:$0xff]  ;;  %s1316_s6 = smov (!%p207_p11, %s688_s6), 63 }
  0x15   : > { %745 = vmatpush.xpose.msk.msra.mxu2 %vm274_vm0, %v269_v0  ;;  %746 = vmatpush.xpose.msk.msra.mxu3 %vm274_vm0, %v269_v0  ;;  %v266_v3 = vld [vmem:[%s1303_s1 + $0x60] sm:$0xff]  ;;  %v265_v4 = vld [vmem:[%s1303_s1 + $0x58] sm:$0xff]  ;;  %v264_v5 = vld [vmem:[%s1303_s1 + $0x50] sm:$0xff]  ;;  %s689_s19 = sshll.u32 %s1316_s6, 3  ;;  %s1199_s6 = scalar_lea.vmem [#allocation2], %s687_s30 }
  0x16   : > { %690 = vmatpush.xpose.msk.msra.mxu0 %vm274_vm0, %v269_v0  ;;  %744 = vmatpush.xpose.msk.msra.mxu1 %vm274_vm0, %v269_v0  ;;  %v263_v6 = vld [vmem:[%s1303_s1 + $0x48] sm:$0xff]  ;;  %v262_v7 = vld [vmem:[%s1303_s1 + $0x40] sm:$0xff]  ;;  %v261_v8 = vld [vmem:[%s1303_s1 + $0x38] sm:$0xff]  ;;  %s1119_s28 = scalar_lea.vmem %s1302_s0, %s689_s19  ;;  %s578_s15 = sshll.u32 %s1199_s6, 4  ;;  %s579_s15 = int_to_ptr.vmem [resolvable:$true] %s578_s15 }
  0x17   : > { %v260_v9 = vld [vmem:[%s1303_s1 + $0x30] sm:$0xff]  ;;  %v259_v10 = vld [vmem:[%s1303_s1 + $0x28] sm:$0xff]  ;;  %v258_v11 = vld [vmem:[%s1303_s1 + $0x20] sm:$0xff]  ;;  %s864_s19 = sshra.s32 %s581_s11, 4  ;;  %s865_s19 = int_to_ptr.hbm [resolvable:$true] %s864_s19 }
  0x18   : > { %v257_v12 = vld [vmem:[%s1303_s1 + $0x18] sm:$0xff]  ;;  %v256_v13 = vld [vmem:[%s1303_s1 + $0x10] sm:$0xff]  ;;  %v255_v14 = vld [vmem:[%s1303_s1 + $0x8] sm:$0xff]  ;;  %s866_s21 = scalar_lea.hbm %s865_s19, 256  ;;  %p871_p1 = scmp.lt.s32.totalorder %s865_s19, %s1305_s3 }
  0x19   : > { %748 = vmatpush.xpose.msk.msra.mxu2 %vm274_vm0, %v268_v1  ;;  %749 = vmatpush.xpose.msk.msra.mxu3 %vm274_vm0, %v268_v1  ;;  %v254_v15 = vld [vmem:[%s1303_s1] sm:$0xff]  ;;  %v239_v20 = vld [vmem:[%s1119_s28 + $0x88] sm:$0xff]  ;;  %v240_v24 = vld [vmem:[%s1119_s28 + $0x90] sm:$0xff]  ;;  %p867_p12 = scmp.ne.s32.totalorder %s865_s19, %s866_s21  ;;  %p872_p2 = scmp.lt.s32.totalorder %s870_s27, %s866_s21 }
  0x1a   : > { %691 = vmatpush.xpose.msk.msra.mxu0 %vm274_vm0, %v268_v1  ;;  %747 = vmatpush.xpose.msk.msra.mxu1 %vm274_vm0, %v268_v1  ;;  %v238_v16 = vld [vmem:[%s1119_s28 + $0x80] sm:$0xff]  ;;  %v247_v21 = vld [vmem:[%s1119_s28 + $0xc8] sm:$0xff]  ;;  %v248_v25 = vld [vmem:[%s1119_s28 + $0xd0] sm:$0xff] }
  0x1b   : > { %v246_v17 = vld [vmem:[%s1119_s28 + $0xc0] sm:$0xff]  ;;  %v223_v22 = vld [vmem:[%s1119_s28 + $0x8] sm:$0xff]  ;;  %v224_v26 = vld [vmem:[%s1119_s28 + $0x10] sm:$0xff]  ;;  %p868_p13 = pnand %p867_p12, %p992_p4  ;;  %p873_p3 = por %p872_p2, %p871_p1 }
  0x1c   : > { %v222_v18 = vld [vmem:[%s1119_s28] sm:$0xff]  ;;  %v231_v23 = vld [vmem:[%s1119_s28 + $0x48] sm:$0xff]  ;;  %v232_v27 = vld [vmem:[%s1119_s28 + $0x50] sm:$0xff] }
  0x1d   : > { %751 = vmatpush.xpose.msk.msra.mxu2 %vm274_vm0, %v267_v2  ;;  %752 = vmatpush.xpose.msk.msra.mxu3 %vm274_vm0, %v267_v2  ;;  %v230_v19 = vld [vmem:[%s1119_s28 + $0x40] sm:$0xff]  ;;  %v241_v28 = vld [vmem:[%s1119_s28 + $0x98] sm:$0xff]  ;;  %v243_v36 = vld [vmem:[%s1119_s28 + $0xa8] sm:$0xff]  ;;  %p869_p0 = pneg %p868_p13 }
  0x1e   : > { %692 = vmatpush.xpose.msk.msra.mxu0 %vm274_vm0, %v267_v2  ;;  %750 = vmatpush.xpose.msk.msra.mxu1 %vm274_vm0, %v267_v2  ;;  %v249_v29 = vld [vmem:[%s1119_s28 + $0xd8] sm:$0xff]  ;;  %v242_v32 = vld [vmem:[%s1119_s28 + $0xa0] sm:$0xff]  ;;  %v251_v37 = vld [vmem:[%s1119_s28 + $0xe8] sm:$0xff] }
  0x1f   : > { %v225_v30 = vld [vmem:[%s1119_s28 + $0x18] sm:$0xff]  ;;  %v250_v33 = vld [vmem:[%s1119_s28 + $0xe0] sm:$0xff]  ;;  %v227_v38 = vld [vmem:[%s1119_s28 + $0x28] sm:$0xff]  ;;  %p874_p5 = pnand %p873_p3, %p869_p0 }
  0x20   : > { %v233_v31 = vld [vmem:[%s1119_s28 + $0x58] sm:$0xff]  ;;  %v226_v34 = vld [vmem:[%s1119_s28 + $0x20] sm:$0xff]  ;;  %v235_v39 = vld [vmem:[%s1119_s28 + $0x68] sm:$0xff] }
  0x21   : > { %754 = vmatpush.xpose.msk.msra.mxu2 %vm274_vm0, %v266_v3  ;;  %755 = vmatpush.xpose.msk.msra.mxu3 %vm274_vm0, %v266_v3  ;;  %v234_v35 = vld [vmem:[%s1119_s28 + $0x60] sm:$0xff]  ;;  %v244_v40 = vld [vmem:[%s1119_s28 + $0xb0] sm:$0xff]  ;;  %v245_v44 = vld [vmem:[%s1119_s28 + $0xb8] sm:$0xff] }
  0x22   : > { %693 = vmatpush.xpose.msk.msra.mxu0 %vm274_vm0, %v266_v3  ;;  %753 = vmatpush.xpose.msk.msra.mxu1 %vm274_vm0, %v266_v3  ;;  %v252_v41 = vld [vmem:[%s1119_s28 + $0xf0] sm:$0xff]  ;;  %v253_v45 = vld [vmem:[%s1119_s28 + $0xf8] sm:$0xff]  ;;  %v1195_v48 = vld [vmem:[%s1304_s2] ss:$0 sm:$0xff] }
  0x23   : > { %v228_v42 = vld [vmem:[%s1119_s28 + $0x30] sm:$0xff]  ;;  %v229_v46 = vld [vmem:[%s1119_s28 + $0x38] sm:$0xff] }
  0x24   : > { %v236_v43 = vld [vmem:[%s1119_s28 + $0x70] sm:$0xff]  ;;  %v237_v47 = vld [vmem:[%s1119_s28 + $0x78] sm:$0xff] }
  0x25   : > { %757 = vmatpush.xpose.msk.msra.mxu2 %vm274_vm0, %v265_v4  ;;  %758 = vmatpush.xpose.msk.msra.mxu3 %vm274_vm0, %v265_v4 }
  0x26   : > { %694 = vmatpush.xpose.msk.msra.mxu0 %vm274_vm0, %v265_v4  ;;  %756 = vmatpush.xpose.msk.msra.mxu1 %vm274_vm0, %v265_v4 }
  0x29   : > { %760 = vmatpush.xpose.msk.msra.mxu2 %vm274_vm0, %v264_v5  ;;  %761 = vmatpush.xpose.msk.msra.mxu3 %vm274_vm0, %v264_v5 }
  0x2a   : > { %695 = vmatpush.xpose.msk.msra.mxu0 %vm274_vm0, %v264_v5  ;;  %759 = vmatpush.xpose.msk.msra.mxu1 %vm274_vm0, %v264_v5 }
  0x2d   : > { %763 = vmatpush.xpose.msk.msra.mxu2 %vm274_vm0, %v263_v6  ;;  %764 = vmatpush.xpose.msk.msra.mxu3 %vm274_vm0, %v263_v6 }
  0x2e   : > { %696 = vmatpush.xpose.msk.msra.mxu0 %vm274_vm0, %v263_v6  ;;  %762 = vmatpush.xpose.msk.msra.mxu1 %vm274_vm0, %v263_v6 }
  0x31   : > { %766 = vmatpush.xpose.msk.msra.mxu2 %vm274_vm0, %v262_v7  ;;  %767 = vmatpush.xpose.msk.msra.mxu3 %vm274_vm0, %v262_v7 }
  0x32   : > { %697 = vmatpush.xpose.msk.msra.mxu0 %vm274_vm0, %v262_v7  ;;  %765 = vmatpush.xpose.msk.msra.mxu1 %vm274_vm0, %v262_v7 }
  0x35   : > { %769 = vmatpush.xpose.msk.msra.mxu2 %vm274_vm0, %v261_v8  ;;  %770 = vmatpush.xpose.msk.msra.mxu3 %vm274_vm0, %v261_v8 }
  0x36   : > { %698 = vmatpush.xpose.msk.msra.mxu0 %vm274_vm0, %v261_v8  ;;  %768 = vmatpush.xpose.msk.msra.mxu1 %vm274_vm0, %v261_v8 }
  0x39   : > { %772 = vmatpush.xpose.msk.msra.mxu2 %vm274_vm0, %v260_v9  ;;  %773 = vmatpush.xpose.msk.msra.mxu3 %vm274_vm0, %v260_v9 }
  0x3a   : > { %699 = vmatpush.xpose.msk.msra.mxu0 %vm274_vm0, %v260_v9  ;;  %771 = vmatpush.xpose.msk.msra.mxu1 %vm274_vm0, %v260_v9 }
  0x3d   : > { %775 = vmatpush.xpose.msk.msra.mxu2 %vm274_vm0, %v259_v10  ;;  %776 = vmatpush.xpose.msk.msra.mxu3 %vm274_vm0, %v259_v10 }
  0x3e   : > { %700 = vmatpush.xpose.msk.msra.mxu0 %vm274_vm0, %v259_v10  ;;  %774 = vmatpush.xpose.msk.msra.mxu1 %vm274_vm0, %v259_v10 }
  0x41   : > { %778 = vmatpush.xpose.msk.msra.mxu2 %vm274_vm0, %v258_v11  ;;  %779 = vmatpush.xpose.msk.msra.mxu3 %vm274_vm0, %v258_v11 }
  0x42   : > { %701 = vmatpush.xpose.msk.msra.mxu0 %vm274_vm0, %v258_v11  ;;  %777 = vmatpush.xpose.msk.msra.mxu1 %vm274_vm0, %v258_v11 }
  0x45   : > { %781 = vmatpush.xpose.msk.msra.mxu2 %vm274_vm0, %v257_v12  ;;  %782 = vmatpush.xpose.msk.msra.mxu3 %vm274_vm0, %v257_v12 }
  0x46   : > { %702 = vmatpush.xpose.msk.msra.mxu0 %vm274_vm0, %v257_v12  ;;  %780 = vmatpush.xpose.msk.msra.mxu1 %vm274_vm0, %v257_v12 }
  0x49   : > { %784 = vmatpush.xpose.msk.msra.mxu2 %vm274_vm0, %v256_v13  ;;  %785 = vmatpush.xpose.msk.msra.mxu3 %vm274_vm0, %v256_v13 }
  0x4a   : > { %703 = vmatpush.xpose.msk.msra.mxu0 %vm274_vm0, %v256_v13  ;;  %783 = vmatpush.xpose.msk.msra.mxu1 %vm274_vm0, %v256_v13 }
  0x4d   : > { %787 = vmatpush.xpose.msk.msra.mxu2 %vm274_vm0, %v255_v14  ;;  %788 = vmatpush.xpose.msk.msra.mxu3 %vm274_vm0, %v255_v14 }
  0x4e   : > { %704 = vmatpush.xpose.msk.msra.mxu0 %vm274_vm0, %v255_v14  ;;  %786 = vmatpush.xpose.msk.msra.mxu1 %vm274_vm0, %v255_v14 }
  0x51   : > { %790 = vmatpush.xpose.msk.msra.mxu2 %vm274_vm0, %v254_v15  ;;  %791 = vmatpush.xpose.msk.msra.mxu3 %vm274_vm0, %v254_v15 }
  0x52   : > { %705 = vmatpush.xpose.msk.msra.mxu0 %vm274_vm0, %v254_v15  ;;  %789 = vmatpush.xpose.msk.msra.mxu1 %vm274_vm0, %v254_v15 }
  0x54   : > { %722 = vmatmul.msk.f32.vlgmr.msra.gmra.mxu2 %vm274_vm0, %v238_v16  ;;  %730 = vmatmul.msk.f32.vlgmr.msra.gmra.mxu3 %vm274_vm0, %v246_v17 }
  0x55   : > { %706 = vmatmul.msk.f32.vlgmr.msra.gmra.mxu0 %vm274_vm0, %v222_v18  ;;  %714 = vmatmul.msk.f32.vlgmr.msra.gmra.mxu1 %vm274_vm0, %v230_v19 }
  0x5c   : > { %723 = vmatmul.msk.f32.gmra.mxu2 %vm274_vm0, %v239_v20  ;;  %731 = vmatmul.msk.f32.gmra.mxu3 %vm274_vm0, %v247_v21 }
  0x5d   : > { %707 = vmatmul.msk.f32.gmra.mxu0 %vm274_vm0, %v223_v22  ;;  %715 = vmatmul.msk.f32.gmra.mxu1 %vm274_vm0, %v231_v23 }
  0x64   : > { %724 = vmatmul.msk.f32.gmra.mxu2 %vm274_vm0, %v240_v24  ;;  %732 = vmatmul.msk.f32.gmra.mxu3 %vm274_vm0, %v248_v25 }
  0x65   : > { %708 = vmatmul.msk.f32.gmra.mxu0 %vm274_vm0, %v224_v26  ;;  %716 = vmatmul.msk.f32.gmra.mxu1 %vm274_vm0, %v232_v27 }
  0x6c   : > { %725 = vmatmul.msk.f32.gmra.mxu2 %vm274_vm0, %v241_v28  ;;  %733 = vmatmul.msk.f32.gmra.mxu3 %vm274_vm0, %v249_v29 }
  0x6d   : > { %709 = vmatmul.msk.f32.gmra.mxu0 %vm274_vm0, %v225_v30  ;;  %717 = vmatmul.msk.f32.gmra.mxu1 %vm274_vm0, %v233_v31 }
  0x74   : > { %726 = vmatmul.msk.f32.gmra.mxu2 %vm274_vm0, %v242_v32  ;;  %734 = vmatmul.msk.f32.gmra.mxu3 %vm274_vm0, %v250_v33 }
  0x75   : > { %710 = vmatmul.msk.f32.gmra.mxu0 %vm274_vm0, %v226_v34  ;;  %718 = vmatmul.msk.f32.gmra.mxu1 %vm274_vm0, %v234_v35 }
  0x7c   : > { %727 = vmatmul.msk.f32.gmra.mxu2 %vm274_vm0, %v243_v36  ;;  %735 = vmatmul.msk.f32.gmra.mxu3 %vm274_vm0, %v251_v37 }
  0x7d   : > { %711 = vmatmul.msk.f32.gmra.mxu0 %vm274_vm0, %v227_v38  ;;  %719 = vmatmul.msk.f32.gmra.mxu1 %vm274_vm0, %v235_v39 }
  0x84   : > { %728 = vmatmul.msk.f32.gmra.mxu2 %vm274_vm0, %v244_v40  ;;  %736 = vmatmul.msk.f32.gmra.mxu3 %vm274_vm0, %v252_v41 }
  0x85   : > { %712 = vmatmul.msk.f32.gmra.mxu0 %vm274_vm0, %v228_v42  ;;  %720 = vmatmul.msk.f32.gmra.mxu1 %vm274_vm0, %v236_v43 }
  0x8c   : > { %729 = vmatmul.msk.f32.gmra.mxu2 %vm274_vm0, %v245_v44  ;;  %737 = vmatmul.msk.f32.gmra.mxu3 %vm274_vm0, %v253_v45 }
  0x8d   : > { %713 = vmatmul.msk.f32.gmra.mxu0 %vm274_vm0, %v229_v46  ;;  %721 = vmatmul.msk.f32.gmra.mxu1 %vm274_vm0, %v237_v47 }
  0xd2   : > { %v436_v49 = vpop.f32.mrf.mxu0  ;;  %v460_v50 = vpop.f32.mrf.mxu1 }
  0xd3   : > { %v437_v51 = vadd.f32 %v1195_v48, %v436_v49  ;;  %v461_v52 = vadd.f32 %v1195_v48, %v460_v50 }
  0xd5   : > { %532 = vst [vmem:[%s1199_s6] sm:$0xff] %v437_v51 }
  0xd6   : > { %540 = vst [vmem:[%s1199_s6 + $0x40] sm:$0xff] %v461_v52 }
  0xd7   : > { %v484_v53 = vpop.f32.mrf.mxu2  ;;  %v508_v54 = vpop.f32.mrf.mxu3 }
  0xd8   : > { %v485_v55 = vadd.f32 %v1195_v48, %v484_v53  ;;  %v509_v56 = vadd.f32 %v1195_v48, %v508_v54 }
  0xda   : > { %548 = vst [vmem:[%s1199_s6 + $0x80] sm:$0xff] %v485_v55  ;;  %v439_v57 = vpop.f32.mrf.mxu0  ;;  %v463_v58 = vpop.f32.mrf.mxu1 }
  0xdb   : > { %556 = vst [vmem:[%s1199_s6 + $0xc0] sm:$0xff] %v509_v56  ;;  %v440_v59 = vadd.f32 %v1195_v48, %v439_v57  ;;  %v464_v60 = vadd.f32 %v1195_v48, %v463_v58 }
  0xdd   : > { %533 = vst [vmem:[%s1199_s6 + $0x8] sm:$0xff] %v440_v59 }
  0xde   : > { %541 = vst [vmem:[%s1199_s6 + $0x48] sm:$0xff] %v464_v60 }
  0xdf   : > { %v487_v61 = vpop.f32.mrf.mxu2  ;;  %v511_v62 = vpop.f32.mrf.mxu3 }
  0xe0   : > { %v488_v63 = vadd.f32 %v1195_v48, %v487_v61  ;;  %v512_v0 = vadd.f32 %v1195_v48, %v511_v62 }
  0xe2   : > { %549 = vst [vmem:[%s1199_s6 + $0x88] sm:$0xff] %v488_v63  ;;  %v442_v1 = vpop.f32.mrf.mxu0  ;;  %v466_v2 = vpop.f32.mrf.mxu1 }
  0xe3   : > { %557 = vst [vmem:[%s1199_s6 + $0xc8] sm:$0xff] %v512_v0  ;;  %v443_v3 = vadd.f32 %v1195_v48, %v442_v1  ;;  %v467_v4 = vadd.f32 %v1195_v48, %v466_v2 }
  0xe5   : > { %534 = vst [vmem:[%s1199_s6 + $0x10] sm:$0xff] %v443_v3 }
  0xe6   : > { %542 = vst [vmem:[%s1199_s6 + $0x50] sm:$0xff] %v467_v4 }
  0xe7   : > { %v490_v5 = vpop.f32.mrf.mxu2  ;;  %v514_v6 = vpop.f32.mrf.mxu3 }
  0xe8   : > { %v491_v7 = vadd.f32 %v1195_v48, %v490_v5  ;;  %v515_v8 = vadd.f32 %v1195_v48, %v514_v6 }
  0xea   : > { %550 = vst [vmem:[%s1199_s6 + $0x90] sm:$0xff] %v491_v7  ;;  %v445_v9 = vpop.f32.mrf.mxu0  ;;  %v469_v10 = vpop.f32.mrf.mxu1 }
  0xeb   : > { %558 = vst [vmem:[%s1199_s6 + $0xd0] sm:$0xff] %v515_v8  ;;  %v446_v11 = vadd.f32 %v1195_v48, %v445_v9  ;;  %v470_v12 = vadd.f32 %v1195_v48, %v469_v10 }
  0xed   : > { %535 = vst [vmem:[%s1199_s6 + $0x18] sm:$0xff] %v446_v11 }
  0xee   : > { %543 = vst [vmem:[%s1199_s6 + $0x58] sm:$0xff] %v470_v12 }
  0xef   : > { %v493_v13 = vpop.f32.mrf.mxu2  ;;  %v517_v14 = vpop.f32.mrf.mxu3 }
  0xf0   : > { %v494_v15 = vadd.f32 %v1195_v48, %v493_v13  ;;  %v518_v16 = vadd.f32 %v1195_v48, %v517_v14 }
  0xf2   : > { %551 = vst [vmem:[%s1199_s6 + $0x98] sm:$0xff] %v494_v15  ;;  %v448_v17 = vpop.f32.mrf.mxu0  ;;  %v472_v18 = vpop.f32.mrf.mxu1 }
  0xf3   : > { %559 = vst [vmem:[%s1199_s6 + $0xd8] sm:$0xff] %v518_v16  ;;  %v449_v19 = vadd.f32 %v1195_v48, %v448_v17  ;;  %v473_v20 = vadd.f32 %v1195_v48, %v472_v18 }
  0xf5   : > { %536 = vst [vmem:[%s1199_s6 + $0x20] sm:$0xff] %v449_v19 }
  0xf6   : > { %544 = vst [vmem:[%s1199_s6 + $0x60] sm:$0xff] %v473_v20 }
  0xf7   : > { %v496_v21 = vpop.f32.mrf.mxu2  ;;  %v520_v22 = vpop.f32.mrf.mxu3 }
  0xf8   : > { %v497_v23 = vadd.f32 %v1195_v48, %v496_v21  ;;  %v521_v24 = vadd.f32 %v1195_v48, %v520_v22 }
  0xfa   : > { %552 = vst [vmem:[%s1199_s6 + $0xa0] sm:$0xff] %v497_v23  ;;  %v451_v25 = vpop.f32.mrf.mxu0  ;;  %v475_v26 = vpop.f32.mrf.mxu1 }
  0xfb   : > { %560 = vst [vmem:[%s1199_s6 + $0xe0] sm:$0xff] %v521_v24  ;;  %v452_v27 = vadd.f32 %v1195_v48, %v451_v25  ;;  %v476_v28 = vadd.f32 %v1195_v48, %v475_v26 }
  0xfd   : > { %537 = vst [vmem:[%s1199_s6 + $0x28] sm:$0xff] %v452_v27 }
  0xfe   : > { %545 = vst [vmem:[%s1199_s6 + $0x68] sm:$0xff] %v476_v28 }
  0xff   : > { %v499_v29 = vpop.f32.mrf.mxu2  ;;  %v523_v30 = vpop.f32.mrf.mxu3 }
 0x100   : > { %v500_v31 = vadd.f32 %v1195_v48, %v499_v29  ;;  %v524_v32 = vadd.f32 %v1195_v48, %v523_v30 }
 0x102   : > { %553 = vst [vmem:[%s1199_s6 + $0xa8] sm:$0xff] %v500_v31  ;;  %v454_v33 = vpop.f32.mrf.mxu0  ;;  %v478_v34 = vpop.f32.mrf.mxu1 }
 0x103   : > { %561 = vst [vmem:[%s1199_s6 + $0xe8] sm:$0xff] %v524_v32  ;;  %v455_v35 = vadd.f32 %v1195_v48, %v454_v33  ;;  %v479_v36 = vadd.f32 %v1195_v48, %v478_v34 }
 0x105   : > { %538 = vst [vmem:[%s1199_s6 + $0x30] sm:$0xff] %v455_v35 }
 0x106   : > { %546 = vst [vmem:[%s1199_s6 + $0x70] sm:$0xff] %v479_v36 }
 0x107   : > { %v502_v37 = vpop.f32.mrf.mxu2  ;;  %v526_v38 = vpop.f32.mrf.mxu3 }
 0x108   : > { %v503_v39 = vadd.f32 %v1195_v48, %v502_v37  ;;  %v527_v40 = vadd.f32 %v1195_v48, %v526_v38 }
 0x10a   : > { %554 = vst [vmem:[%s1199_s6 + $0xb0] sm:$0xff] %v503_v39  ;;  %v457_v41 = vpop.f32.mrf.mxu0  ;;  %v481_v42 = vpop.f32.mrf.mxu1 }
 0x10b   : > { %562 = vst [vmem:[%s1199_s6 + $0xf0] sm:$0xff] %v527_v40  ;;  %v458_v43 = vadd.f32 %v1195_v48, %v457_v41  ;;  %v482_v44 = vadd.f32 %v1195_v48, %v481_v42 }
 0x10d   : > { %539 = vst [vmem:[%s1199_s6 + $0x38] sm:$0xff] %v458_v43 }
 0x10e   : > { %547 = vst [vmem:[%s1199_s6 + $0x78] sm:$0xff] %v482_v44 }
 0x10f   : > { %v505_v45 = vpop.f32.mrf.mxu2  ;;  %v529_v46 = vpop.f32.mrf.mxu3 }
 0x110   : > { %v506_v47 = vadd.f32 %v1195_v48, %v505_v45  ;;  %v530_v49 = vadd.f32 %v1195_v48, %v529_v46 }
 0x112   : > { %555 = vst [vmem:[%s1199_s6 + $0xb8] sm:$0xff] %v506_v47 }
 0x113   : > { %563 = vst [vmem:[%s1199_s6 + $0xf8] sm:$0xff] %v530_v49 }
 0x114   : > { %877 = shalt.err (!%p874_p5)
}
 0x115   : > { %s930_s29 = smov 128   ;;  %s931_s4 = smov 8  }
 0x116   : > { %792 = dma.vmem_to_hbm [thread:$0]  (%p992_p4), %s579_s15, 4096, %s581_s11, %s565_s18, %s930_s29, %s930_s29, %s931_s4  }
 0x117 PF: > { %p798_p6 = scmp.ge.s32.totalorder %s928_s17, 2  ;;  %s595_s5 = sand.u32 1, %s908_s12  }
 0x118   : > { %s596_s6 = scalar_lea.sflag [#allocation3], %s595_s5 }
 0x119   : > { %p795_p7 = pnand %p798_p6, %p999_p8 }
 0x11b   : > { %p796_p9 = pneg %p795_p7 }
 0x11d   : > { %903 = dma.done.wait (%p796_p9), %s596_s6, 4096  }
 0x11e   : > { %905 = vsyncadd (%p796_p9), %s596_s6, 4294963200  ;;  %s16_s17 = sadd.s32 1, %s928_s17   ;;  %s1308_s12 = smov %s912_s13 }
 0x11f   : > { %p13_p10 = scmp.ge.s32.totalorder %s16_s17, 4   ;;  %s1309_s13 = smov %s916_s14 }
 0x120   : > { %s1310_s14 = smov %s1005_s25  ;;  %s1311_s15 = smov %s924_s16 }
 0x121   : > { %s1312_s16 = smov %s1314_s20  ;;  %15 = sbr.rel (!%p13_p10) target bundleno = 4 (0x4), region = 73 }
 0x126   :  { %602 = vsyncpa [#allocation3], 1 }
 0x127   :  { %604 = vsyncpa [#allocation3 + $0x1], 1 }

</bundles_post_ra>
